<compile_context>
chip_gen: v5e
topology: v5e:2x2
jax: 0.10.0
libtpu: 0.0.40
codegen_flags: <defaults>
</compile_context>

<pallas_src>
import functools

import jax
import jax.numpy as jnp
from jax import lax
from jax.experimental import pallas as pl
from jax.experimental.pallas import tpu as pltpu


def _round_up(x, n):
    return ((x + n - 1) // n) * n


def _mlm_head_kernel(x_ref, w1_ref, b1_ref, g_ref, beta_ref, w2_ref, b2_ref,
                     o_ref, fc_ref, *, eps, inv_hidden):
    # ---- Stage 1: dense1 + GELU + LayerNorm, once per token tile ----------
    @pl.when(pl.program_id(1) == 0)
    def _():
        h = jnp.dot(x_ref[...], w1_ref[...],
                    preferred_element_type=jnp.float32)
        h = h + b1_ref[...].astype(jnp.float32)
        # GELU (tanh approximation -> VPU + EUP tanh).
        # TODO(synk): exact erf-based GELU if the config's hidden_act needs it.
        h = jax.nn.gelu(h, approximate=True)
        # LayerNorm over the last (lane) axis, f32 math, sum * 1/H + rsqrt.
        mean = jnp.sum(h, axis=-1, keepdims=True) * inv_hidden
        c = h - mean
        var = jnp.sum(c * c, axis=-1, keepdims=True) * inv_hidden
        y = c * lax.rsqrt(var + eps)
        y = y * g_ref[...].astype(jnp.float32) + beta_ref[...].astype(jnp.float32)
        fc_ref[...] = y.astype(fc_ref.dtype)

    # ---- Stage 2: vocab projection for this (token, vocab) tile -----------
    out = jnp.dot(fc_ref[...], w2_ref[...],
                  preferred_element_type=jnp.float32)
    out = out + b2_ref[...].astype(jnp.float32)
    o_ref[...] = out.astype(o_ref.dtype)


def mlm_head(x, w1, b1, gamma, beta, w2, b2, *, eps=1e-12, tm=256, tn=512,
             vmem_limit_bytes=None):
    """x: [..., hidden]; w1: [hidden, hidden] (x @ w1); w2: [hidden, vocab]."""
    *lead, hidden = x.shape
    vocab = w2.shape[1]
    assert w1.shape == (hidden, hidden)
    assert w2.shape == (hidden, vocab)

    x2 = x.reshape(-1, hidden)
    m = x2.shape[0]

    # Row tile: multiple of the f32 sublane pack (8), no bigger than needed;
    # pad the token axis so the grid always divides evenly (tail handling).
    tm = max(8, min(tm, _round_up(m, 8)))
    m_pad = _round_up(m, tm)
    if m_pad != m:
        x2 = jnp.pad(x2, ((0, m_pad - m), (0, 0)))

    # Vocab tile: lane-dense (multiple of 128) unless vocab itself is smaller.
    tn = min(tn, _round_up(vocab, 128))
    v_pad = _round_up(vocab, tn)
    if v_pad != vocab:
        w2 = jnp.pad(w2, ((0, 0), (0, v_pad - vocab)))
        b2 = jnp.pad(b2, ((0, v_pad - vocab),))

    b1_2 = b1.reshape(1, hidden)
    g2 = gamma.reshape(1, hidden)
    be2 = beta.reshape(1, hidden)
    b2_2 = b2.reshape(1, v_pad)

    kernel = functools.partial(_mlm_head_kernel, eps=eps,
                               inv_hidden=1.0 / hidden)

    itemsize = jnp.dtype(x.dtype).itemsize
    cost = pl.CostEstimate(
        flops=2 * m_pad * hidden * hidden + 2 * m_pad * hidden * v_pad,
        transcendentals=m_pad * hidden,                       # tanh in GELU
        bytes_accessed=(x2.size + w1.size + w2.size) * itemsize
        + m_pad * v_pad * itemsize,
    )

    out = pl.pallas_call(
        kernel,
        out_shape=jax.ShapeDtypeStruct((m_pad, v_pad), x.dtype),
        grid_spec=pltpu.PrefetchScalarGridSpec(
            num_scalar_prefetch=0,
            grid=(m_pad // tm, v_pad // tn),
            in_specs=[
                pl.BlockSpec((tm, hidden), lambda i, j: (i, 0)),      # x
                pl.BlockSpec((hidden, hidden), lambda i, j: (0, 0)),  # W1
                pl.BlockSpec((1, hidden), lambda i, j: (0, 0)),       # b1
                pl.BlockSpec((1, hidden), lambda i, j: (0, 0)),       # LN gamma
                pl.BlockSpec((1, hidden), lambda i, j: (0, 0)),       # LN beta
                pl.BlockSpec((hidden, tn), lambda i, j: (0, j)),      # W2 tile
                pl.BlockSpec((1, tn), lambda i, j: (0, j)),           # b2 tile
            ],
            out_specs=pl.BlockSpec((tm, tn), lambda i, j: (i, j)),
            scratch_shapes=[pltpu.VMEM((tm, hidden), x.dtype)],       # fc cache
        ),
        compiler_params=pltpu.CompilerParams(
            dimension_semantics=("parallel", "arbitrary"),
            vmem_limit_bytes=vmem_limit_bytes),
        cost_estimate=cost,
    )(x2, w1, b1_2, g2, be2, w2, b2_2)

    out = out[:m, :vocab]
    return out.reshape(*lead, vocab)


def _reference(x, w1, b1, gamma, beta, w2, b2, eps):
    h = x.astype(jnp.float32) @ w1.astype(jnp.float32) + b1
    h = jax.nn.gelu(h, approximate=True)
    mean = jnp.mean(h, axis=-1, keepdims=True)
    var = jnp.mean((h - mean) ** 2, axis=-1, keepdims=True)
    h = (h - mean) / jnp.sqrt(var + eps) * gamma + beta
    return h @ w2.astype(jnp.float32) + b2


if __name__ == "__main__":
    config = {
        "hidden_size": 64,
        "vocab_size": 128,
        "hidden_act": "gelu",
        "layer_norm_eps": 1e-12,
    }
    batch, seq = 2, 8
    hidden, vocab = config["hidden_size"], config["vocab_size"]

    key = jax.random.PRNGKey(0)
    k1, k2, k3, k4, k5 = jax.random.split(key, 5)

    x = jax.random.normal(k1, (batch, seq, hidden), jnp.float32)

    # PyTorch Linear stores weight as (out, in); we store the transpose
    # (in, out) so the kernel computes x @ W directly.
    bound1 = 1.0 / (hidden ** 0.5)
    w1 = jax.random.uniform(k2, (hidden, hidden), jnp.float32, -bound1, bound1)
    b1 = jax.random.uniform(k3, (hidden,), jnp.float32, -bound1, bound1)
    gamma = jnp.ones((hidden,), jnp.float32)   # LayerNorm weight
    beta = jnp.zeros((hidden,), jnp.float32)   # LayerNorm bias
    w2 = jax.random.uniform(k4, (hidden, vocab), jnp.float32, -bound1, bound1)
    b2 = jax.random.uniform(k5, (vocab,), jnp.float32, -bound1, bound1)

    out = mlm_head(x, w1, b1, gamma, beta, w2, b2,
                   eps=config["layer_norm_eps"])
    out = jax.block_until_ready(out)

    ref = _reference(x, w1, b1, gamma, beta, w2, b2,
                     config["layer_norm_eps"])
    assert out.shape == (batch, seq, vocab)
    assert jnp.allclose(out, ref, atol=1e-4, rtol=1e-4), "mismatch vs reference"

    print("KERNEL_OK")
</pallas_src>

<mosaic_0001>
module attributes {stable_mosaic.version = 11 : i64} {
  func.func @_mlm_head_kernel(%arg0: i32, %arg1: i32, %arg2: memref<16x64xf32, #tpu.memory_space<vmem>>, %arg3: memref<64x64xf32, #tpu.memory_space<vmem>>, %arg4: memref<1x64xf32, #tpu.memory_space<vmem>>, %arg5: memref<1x64xf32, #tpu.memory_space<vmem>>, %arg6: memref<1x64xf32, #tpu.memory_space<vmem>>, %arg7: memref<64x128xf32, #tpu.memory_space<vmem>>, %arg8: memref<1x128xf32, #tpu.memory_space<vmem>>, %arg9: memref<16x128xf32, #tpu.memory_space<vmem>>, %arg10: memref<16x64xf32, #tpu.memory_space<vmem>>) attributes {dimension_semantics = [#tpu.dimension_semantics<parallel>, #tpu.dimension_semantics<arbitrary>], iteration_bounds = array<i64: 1, 1>, scalar_prefetch = 0 : i64, scratch_operands = 1 : i64, tpu.core_type = #tpu.core_type<tc>, window_params = [{transform_indices = @transform_0, window_bounds = array<i64: 16, 64>}, {pipeline_mode = #tpu.pipeline_mode<synchronous>, transform_indices = @transform_1, window_bounds = array<i64: 64, 64>}, {pipeline_mode = #tpu.pipeline_mode<synchronous>, transform_indices = @transform_2, window_bounds = array<i64: 1, 64>}, {pipeline_mode = #tpu.pipeline_mode<synchronous>, transform_indices = @transform_3, window_bounds = array<i64: 1, 64>}, {pipeline_mode = #tpu.pipeline_mode<synchronous>, transform_indices = @transform_4, window_bounds = array<i64: 1, 64>}, {transform_indices = @transform_5, window_bounds = array<i64: 64, 128>}, {transform_indices = @transform_6, window_bounds = array<i64: 1, 128>}, {transform_indices = @transform_7, window_bounds = array<i64: 16, 128>}]} {
    %c0_i32 = arith.constant 0 : i32
    %0 = arith.cmpi eq, %arg1, %c0_i32 : i32
    %1 = arith.extui %0 : i1 to i32
    %c0_i32_0 = arith.constant 0 : i32
    %2 = arith.cmpi ne, %1, %c0_i32_0 : i32
    scf.if %2 {
      %c0_8 = arith.constant 0 : index
      %c0_9 = arith.constant 0 : index
      %10 = vector.load %arg2[%c0_8, %c0_9] : memref<16x64xf32, #tpu.memory_space<vmem>>, vector<16x64xf32>
      %c0_10 = arith.constant 0 : index
      %c0_11 = arith.constant 0 : index
      %11 = vector.load %arg3[%c0_10, %c0_11] : memref<64x64xf32, #tpu.memory_space<vmem>>, vector<64x64xf32>
      %cst_12 = arith.constant dense<0.000000e+00> : vector<16x64xf32>
      %12 = tpu.matmul %10, %11, %cst_12 {dimension_numbers = #tpu.dot_dimension_numbers<[1], [0], [0], [1], [0, 0, 1, 1], [], []>} : vector<16x64xf32>, vector<64x64xf32>, vector<16x64xf32> -> vector<16x64xf32>
      %c0_13 = arith.constant 0 : index
      %c0_14 = arith.constant 0 : index
      %13 = vector.load %arg4[%c0_13, %c0_14] : memref<1x64xf32, #tpu.memory_space<vmem>>, vector<1x64xf32>
      %14 = vector.broadcast %13 : vector<1x64xf32> to vector<16x64xf32>
      %15 = arith.addf %12, %14 : vector<16x64xf32>
      %16 = arith.mulf %15, %15 : vector<16x64xf32>
      %17 = arith.mulf %15, %16 : vector<16x64xf32>
      %cst_15 = arith.constant 4.471500e-02 : f32
      %18 = vector.broadcast %cst_15 : f32 to vector<16x64xf32>
      %19 = arith.mulf %18, %17 : vector<16x64xf32>
      %20 = arith.addf %15, %19 : vector<16x64xf32>
      %cst_16 = arith.constant 0.797884583 : f32
      %21 = vector.broadcast %cst_16 : f32 to vector<16x64xf32>
      %22 = arith.mulf %21, %20 : vector<16x64xf32>
      %23 = math.tanh %22 : vector<16x64xf32>
      %cst_17 = arith.constant 1.000000e+00 : f32
      %24 = vector.broadcast %cst_17 : f32 to vector<16x64xf32>
      %25 = arith.addf %24, %23 : vector<16x64xf32>
      %cst_18 = arith.constant 5.000000e-01 : f32
      %26 = vector.broadcast %cst_18 : f32 to vector<16x64xf32>
      %27 = arith.mulf %26, %25 : vector<16x64xf32>
      %28 = arith.mulf %15, %27 : vector<16x64xf32>
      %cst_19 = arith.constant dense<0.000000e+00> : vector<16xf32>
      %29 = vector.multi_reduction <add>, %28, %cst_19 [1] : vector<16x64xf32> to vector<16xf32>
      %30 = vector.shape_cast %29 : vector<16xf32> to vector<16x1xf32>
      %cst_20 = arith.constant 1.562500e-02 : f32
      %31 = vector.broadcast %cst_20 : f32 to vector<16x1xf32>
      %32 = arith.mulf %30, %31 : vector<16x1xf32>
      %33 = vector.broadcast %32 : vector<16x1xf32> to vector<16x64xf32>
      %34 = arith.subf %28, %33 : vector<16x64xf32>
      %35 = arith.mulf %34, %34 : vector<16x64xf32>
      %cst_21 = arith.constant dense<0.000000e+00> : vector<16xf32>
      %36 = vector.multi_reduction <add>, %35, %cst_21 [1] : vector<16x64xf32> to vector<16xf32>
      %37 = vector.shape_cast %36 : vector<16xf32> to vector<16x1xf32>
      %cst_22 = arith.constant 1.562500e-02 : f32
      %38 = vector.broadcast %cst_22 : f32 to vector<16x1xf32>
      %39 = arith.mulf %37, %38 : vector<16x1xf32>
      %cst_23 = arith.constant 9.99999996E-13 : f32
      %40 = vector.broadcast %cst_23 : f32 to vector<16x1xf32>
      %41 = arith.addf %39, %40 : vector<16x1xf32>
      %42 = math.rsqrt %41 : vector<16x1xf32>
      %43 = vector.broadcast %42 : vector<16x1xf32> to vector<16x64xf32>
      %44 = arith.mulf %34, %43 : vector<16x64xf32>
      %c0_24 = arith.constant 0 : index
      %c0_25 = arith.constant 0 : index
      %45 = vector.load %arg5[%c0_24, %c0_25] : memref<1x64xf32, #tpu.memory_space<vmem>>, vector<1x64xf32>
      %46 = vector.broadcast %45 : vector<1x64xf32> to vector<16x64xf32>
      %47 = arith.mulf %44, %46 : vector<16x64xf32>
      %c0_26 = arith.constant 0 : index
      %c0_27 = arith.constant 0 : index
      %48 = vector.load %arg6[%c0_26, %c0_27] : memref<1x64xf32, #tpu.memory_space<vmem>>, vector<1x64xf32>
      %49 = vector.broadcast %48 : vector<1x64xf32> to vector<16x64xf32>
      %50 = arith.addf %47, %49 : vector<16x64xf32>
      %c0_28 = arith.constant 0 : index
      %c0_29 = arith.constant 0 : index
      %51 = vector.load %arg10[%c0_28, %c0_29] : memref<16x64xf32, #tpu.memory_space<vmem>>, vector<16x64xf32>
      tpu.vector_store %arg10[%c0_28, %c0_29], %50 {strides = array<i32>} : memref<16x64xf32, #tpu.memory_space<vmem>>, vector<16x64xf32>,
    } else {
    }
    %c0 = arith.constant 0 : index
    %c0_1 = arith.constant 0 : index
    %3 = vector.load %arg10[%c0, %c0_1] : memref<16x64xf32, #tpu.memory_space<vmem>>, vector<16x64xf32>
    %c0_2 = arith.constant 0 : index
    %c0_3 = arith.constant 0 : index
    %4 = vector.load %arg7[%c0_2, %c0_3] : memref<64x128xf32, #tpu.memory_space<vmem>>, vector<64x128xf32>
    %cst = arith.constant dense<0.000000e+00> : vector<16x128xf32>
    %5 = tpu.matmul %3, %4, %cst {dimension_numbers = #tpu.dot_dimension_numbers<[1], [0], [0], [1], [0, 0, 1, 1], [], []>} : vector<16x64xf32>, vector<64x128xf32>, vector<16x128xf32> -> vector<16x128xf32>
    %c0_4 = arith.constant 0 : index
    %c0_5 = arith.constant 0 : index
    %6 = vector.load %arg8[%c0_4, %c0_5] : memref<1x128xf32, #tpu.memory_space<vmem>>, vector<1x128xf32>
    %7 = vector.broadcast %6 : vector<1x128xf32> to vector<16x128xf32>
    %8 = arith.addf %5, %7 : vector<16x128xf32>
    %c0_6 = arith.constant 0 : index
    %c0_7 = arith.constant 0 : index
    %9 = vector.load %arg9[%c0_6, %c0_7] : memref<16x128xf32, #tpu.memory_space<vmem>>, vector<16x128xf32>
    tpu.vector_store %arg9[%c0_6, %c0_7], %8 {strides = array<i32>} : memref<16x128xf32, #tpu.memory_space<vmem>>, vector<16x128xf32>,
    return
  }
  func.func @transform_0(%arg0: i32, %arg1: i32) -> (i32, i32) {
    %c0_i32 = arith.constant 0 : i32
    %c0_i32_0 = arith.constant 0 : i32
    return %arg0, %c0_i32 : i32, i32
  }
  func.func @transform_1(%arg0: i32, %arg1: i32) -> (i32, i32) {
    %c0_i32 = arith.constant 0 : i32
    %c0_i32_0 = arith.constant 0 : i32
    %c0_i32_1 = arith.constant 0 : i32
    return %c0_i32, %c0_i32_0 : i32, i32
  }
  func.func @transform_2(%arg0: i32, %arg1: i32) -> (i32, i32) {
    %c0_i32 = arith.constant 0 : i32
    %c0_i32_0 = arith.constant 0 : i32
    %c0_i32_1 = arith.constant 0 : i32
    return %c0_i32, %c0_i32_0 : i32, i32
  }
  func.func @transform_3(%arg0: i32, %arg1: i32) -> (i32, i32) {
    %c0_i32 = arith.constant 0 : i32
    %c0_i32_0 = arith.constant 0 : i32
    %c0_i32_1 = arith.constant 0 : i32
    return %c0_i32, %c0_i32_0 : i32, i32
  }
  func.func @transform_4(%arg0: i32, %arg1: i32) -> (i32, i32) {
    %c0_i32 = arith.constant 0 : i32
    %c0_i32_0 = arith.constant 0 : i32
    %c0_i32_1 = arith.constant 0 : i32
    return %c0_i32, %c0_i32_0 : i32, i32
  }
  func.func @transform_5(%arg0: i32, %arg1: i32) -> (i32, i32) {
    %c0_i32 = arith.constant 0 : i32
    %c0_i32_0 = arith.constant 0 : i32
    return %c0_i32, %arg1 : i32, i32
  }
  func.func @transform_6(%arg0: i32, %arg1: i32) -> (i32, i32) {
    %c0_i32 = arith.constant 0 : i32
    %c0_i32_0 = arith.constant 0 : i32
    return %c0_i32, %arg1 : i32, i32
  }
  func.func @transform_7(%arg0: i32, %arg1: i32) -> (i32, i32) {
    %c0_i32 = arith.constant 0 : i32
    return %arg0, %arg1 : i32, i32
  }
}

</mosaic_0001>

<bundles_post_ra>
// kernel: tpu_custom_call.1
= control target key start
LH: loop header
LB: loop body
LE: loop exit
PB: predicated region body
PF: predicated region fallthrough
CT: control target
= control target key end

     0   :  { %12 = vsyncpa [#allocation4], 0  ;;  %s501_s0 = inlined_call_operand.hbm [shape: f32[16,64], index: 0, kind: input, shape index: {}]   ;;  %s502_s1 = inlined_call_operand.hbm [shape: f32[64,64], index: 1, kind: input, shape index: {}]   ;;  %s503_s2 = inlined_call_operand.vmem [shape: f32[1,64], index: 2, kind: input, shape index: {}]   ;;  %s504_s3 = inlined_call_operand.vmem [shape: f32[1,64], index: 3, kind: input, shape index: {}]   ;;  %s505_s4 = inlined_call_operand.vmem [shape: f32[1,64], index: 4, kind: input, shape index: {}]   ;;  %s506_s5 = inlined_call_operand.hbm [shape: f32[64,128], index: 5, kind: input, shape index: {}]   ;;  %s507_s6 = inlined_call_operand.vmem [shape: f32[1,128], index: 6, kind: input, shape index: {}]   ;;  %s508_s7 = inlined_call_operand.hbm [shape: f32[16,128], index: 7, kind: output, shape index: {}]  }
   0x1   :  { %13 = vsyncpa [#allocation7], 0 }
   0x2   :  { %14 = vsyncpa [#allocation5], 0  ;;  %s32_s26 = sshll.u32 %s502_s1, 4  ;;  %s404_s27 = smov [#allocation6]   ;;  %s33_s26 = int_to_ptr.hbm [resolvable:$true] %s32_s26 }
   0x3   :  { %s34_s28 = sshll.u32 %s404_s27, 4  ;;  %s19_s8 = sshll.u32 %s501_s0, 4  ;;  %s35_s28 = int_to_ptr.vmem [resolvable:$true] %s34_s28  ;;  %s20_s8 = int_to_ptr.hbm [resolvable:$true] %s19_s8 }
   0x4   :  { %s405_s9 = smov 128   ;;  %s406_s10 = smov 8  }
   0x5   :  { %40 = dma.hbm_to_vmem [thread:$0]  %s33_s26, 1024, %s35_s28, [#allocation7], %s405_s9, %s405_s9, %s406_s10  }
   0x6   :  { %s407_s11 = smov [#allocation3]   ;;  %s51_s1 = sshll.u32 %s506_s5, 4  ;;  %s52_s1 = int_to_ptr.hbm [resolvable:$true] %s51_s1 }
   0x7   :  { %s21_s12 = sshll.u32 %s407_s11, 4  ;;  %s408_s0 = smov [#allocation8]   ;;  %s22_s12 = int_to_ptr.vmem [resolvable:$true] %s21_s12 }
   0x8   :  { %27 = dma.hbm_to_vmem [thread:$0]  %s20_s8, 256, %s22_s12, [#allocation4], %s405_s9, %s405_s9, %s406_s10  }
   0x9   :  { %s53_s15 = sshll.u32 %s408_s0, 4  ;;  %s54_s15 = int_to_ptr.vmem [resolvable:$true] %s53_s15 }
   0xa   :  { %59 = dma.hbm_to_vmem [thread:$0]  %s52_s1, 1024, %s54_s15, [#allocation7], %s405_s9, %s405_s9, %s406_s10  }
   0xb   :  { %398 = dma.done.wait [#allocation4], 256  }
   0xc   :  { %399 = vsyncadd [#allocation4], 4294967040 }
   0xd   :  { %400 = dma.done.wait [#allocation7], 2048  }
   0xe   :  { %401 = vsyncadd [#allocation7], 4294965248  ;;  %v87_v0 = vld [vmem:[#allocation6 + $0x38] sm:$0xff]  ;;  %v86_v1 = vld [vmem:[#allocation6 + $0x30] sm:$0xff]  ;;  %vm92_vm0 = vcmask 523264   ;;  %s409_s20 = smov [#allocation9]  }
   0xf   :  { %107 = vmatpush.msra.mxu0 %v87_v0  ;;  %268 = vmatpush.msra.mxu2 %v87_v0  ;;  %v85_v2 = vld [vmem:[#allocation6 + $0x28] sm:$0xff]  ;;  %v84_v3 = vld [vmem:[#allocation6 + $0x20] sm:$0xff]  ;;  %v83_v4 = vld [vmem:[#allocation6 + $0x18] sm:$0xff]  ;;  %s248_s21 = sshll.u32 %s409_s20, 4  ;;  %s250_s24 = sshll.u32 %s508_s7, 4  ;;  %s249_s21 = int_to_ptr.vmem [resolvable:$true] %s248_s21  ;;  %s251_s24 = int_to_ptr.hbm [resolvable:$true] %s250_s24 }
  0x10   :  { %v82_v5 = vld [vmem:[#allocation6 + $0x10] sm:$0xff]  ;;  %v81_v6 = vld [vmem:[#allocation6 + $0x8] sm:$0xff]  ;;  %v80_v7 = vld [vmem:[#allocation6] sm:$0xff] }
  0x11   :  { %108 = vmatpush.msra.mxu0 %v86_v1  ;;  %269 = vmatpush.msra.mxu2 %v86_v1  ;;  %v78_v8 = vld [vmem:[#allocation3] sm:$0xff]  ;;  %v79_v9 = vld [vmem:[#allocation3 + $0x8] sm:$0xff]  ;;  %v290_v10 = vld [vmem:[%s503_s2] ss:$0 sm:$0xff] }
  0x12   :  { %v207_v45 = vld [vmem:[#allocation8 + $0x38] sm:$0xff]  ;;  %v206_v46 = vld [vmem:[#allocation8 + $0x30] sm:$0xff]  ;;  %v205_v47 = vld [vmem:[#allocation8 + $0x28] sm:$0xff] }
  0x13   :  { %109 = vmatpush.msra.mxu0 %v85_v2  ;;  %270 = vmatpush.msra.mxu2 %v85_v2  ;;  %v204_v48 = vld [vmem:[#allocation8 + $0x20] sm:$0xff]  ;;  %v203_v49 = vld [vmem:[#allocation8 + $0x18] sm:$0xff]  ;;  %v202_v50 = vld [vmem:[#allocation8 + $0x10] sm:$0xff] }
  0x14   :  { %276 = vmatpush.msra.mxu3 %v207_v45  ;;  %227 = vmatpush.msra.mxu1 %v207_v45  ;;  %v201_v53 = vld [vmem:[#allocation8 + $0x8] sm:$0xff]  ;;  %v200_v55 = vld [vmem:[#allocation8] sm:$0xff] }
  0x15   :  { %110 = vmatpush.msra.mxu0 %v84_v3  ;;  %271 = vmatpush.msra.mxu2 %v84_v3  ;;  %v291_v3 = vld [vmem:[%s504_s3] ss:$0 sm:$0xff] }
  0x16   :  { %277 = vmatpush.msra.mxu3 %v206_v46  ;;  %228 = vmatpush.msra.mxu1 %v206_v46 }
  0x17   :  { %111 = vmatpush.msra.mxu0 %v83_v4  ;;  %272 = vmatpush.msra.mxu2 %v83_v4 }
  0x18   :  { %278 = vmatpush.msra.mxu3 %v205_v47  ;;  %229 = vmatpush.msra.mxu1 %v205_v47 }
  0x19   :  { %112 = vmatpush.msra.mxu0 %v82_v5  ;;  %273 = vmatpush.msra.mxu2 %v82_v5 }
  0x1a   :  { %279 = vmatpush.msra.mxu3 %v204_v48  ;;  %230 = vmatpush.msra.mxu1 %v204_v48 }
  0x1b   :  { %113 = vmatpush.msra.mxu0 %v81_v6  ;;  %274 = vmatpush.msra.mxu2 %v81_v6  ;;  %v292_v6 = vld [vmem:[%s505_s4] ss:$0 sm:$0xff] }
  0x1c   :  { %280 = vmatpush.msra.mxu3 %v203_v49  ;;  %231 = vmatpush.msra.mxu1 %v203_v49 }
  0x1d   :  { %114 = vmatpush.msra.mxu0 %v80_v7  ;;  %275 = vmatpush.msra.mxu2 %v80_v7 }
  0x1e   :  { %264 = vmatmul.msk.f32.vlgmr.msra.gmra.mxu0 %vm92_vm0, %v78_v8  ;;  %265 = vmatmul.msk.f32.vlgmr.msra.gmra.mxu2 %vm92_vm0, %v79_v9 }
  0x1f   :  { %281 = vmatpush.msra.mxu3 %v202_v50  ;;  %232 = vmatpush.msra.mxu1 %v202_v50 }
  0x21   :  { %282 = vmatpush.msra.mxu3 %v201_v53  ;;  %233 = vmatpush.msra.mxu1 %v201_v53 }
  0x23   :  { %283 = vmatpush.msra.mxu3 %v200_v55  ;;  %234 = vmatpush.msra.mxu1 %v200_v55 }
  0x9b   :  { %v116_v11 = vpop.f32.mrf.mxu0 }
  0x9c   :  { %v117_v12 = vadd.f32 %v290_v10, %v116_v11 }
  0x9e   :  { %v122_v13 = vmul.f32 %v117_v12, %v117_v12 }
  0xa0   :  { %v124_v14 = vmul.f32 %v122_v13, %v117_v12 }
  0xa1   :  { %v119_v15 = vpop.f32.mrf.mxu2 }
  0xa2   :  { %v126_v16 = vmul.f32 0.044715, %v124_v14  ;;  %v120_v17 = vadd.f32 %v290_v10, %v119_v15 }
  0xa4   :  { %v123_v18 = vmul.f32 %v120_v17, %v120_v17  ;;  %v128_v19 = vadd.f32 %v126_v16, %v117_v12 }
  0xa6   :  { %v125_v20 = vmul.f32 %v123_v18, %v120_v17  ;;  %v130_v22 = vmul.f32 0.7978846, %v128_v19  ;;  %v293_v19 = vld [vmem:[%s507_s6] ss:$0 sm:$0xff] }
  0xa8   :  { %v127_v21 = vmul.f32 0.044715, %v125_v20  ;;  %294 = vtanh.f32 %v130_v22 }
  0xaa   :  { %v129_v23 = vadd.f32 %v127_v21, %v120_v17 }
  0xac   :  { %v131_v24 = vmul.f32 0.7978846, %v129_v23 }
  0xae   :  { %296 = vtanh.f32 %v131_v24  ;;  %v295_v25 = vpop.eup %294 }
  0xaf   :  { %v134_v29 = vadd.f32 1.0, %v295_v25 }
  0xb1   :  { %v136_v32 = vmul.f32 0.5, %v134_v29 }
  0xb3   :  { %v138_v33 = vmul.f32 %v136_v32, %v117_v12 }
  0xb4   :  { %v297_v26 = vpop.eup %296 }
  0xb5   :  { %v135_v27 = vadd.f32 1.0, %v297_v26  ;;  %v140_v34 = vsel %vm92_vm0, %v138_v33, 0.0 }
  0xb7   :  { %v137_v28 = vmul.f32 0.5, %v135_v27 }
  0xb9   :  { %v139_v30 = vmul.f32 %v137_v28, %v120_v17 }
  0xbb   :  { %v143_v31 = vsel %vm92_vm0, %v139_v30, 0.0 }
  0xbc   :  { %144 = vadd.xlane.f32.xlu0 %v143_v31 }
  0xc4   :  { %141 = vadd.xlane.f32.xlu0 %v140_v34 }
 0x12f   :  { %v145_v35 = vpop.xlane.xlu0 %144 }
 0x130   :  { %v147_v36 = vmul.f32 0.015625, %v145_v35 }
 0x132   :  { %v149_v37 = vsub.f32 %v139_v30, %v147_v36 }
 0x134   :  { %v151_v38 = vmul.f32 %v149_v37, %v149_v37 }
 0x136   :  { %v155_v39 = vsel %vm92_vm0, %v151_v38, 0.0 }
 0x137   :  { %156 = vadd.xlane.f32.xlu1 %v155_v39  ;;  %v142_v40 = vpop.xlane.xlu0 %141 }
 0x138   :  { %v146_v41 = vmul.f32 0.015625, %v142_v40 }
 0x13a   :  { %v476_v42 = vsub.f32 %v138_v33, %v146_v41 }
 0x13c   :  { %v150_v43 = vmul.f32 %v476_v42, %v476_v42 }
 0x13e   :  { %v152_v44 = vsel %vm92_vm0, %v150_v43, 0.0 }
 0x13f   :  { %153 = vadd.xlane.f32.xlu1 %v152_v44 }
 0x1aa   :  { %v157_v51 = vpop.xlane.xlu1 %156 }
 0x1ab   :  { %v159_v52 = vmul.f32 0.015625, %v157_v51 }
 0x1ad   :  { %v161_v54 = vadd.f32 1e-12, %v159_v52 }
 0x1af   :  { %298 = vrsqrt.f32 %v161_v54  ;;  %vm178_vm2 = vweird.f32 %v161_v54 }
 0x1b2   :  { %v154_v56 = vpop.xlane.xlu1 %153 }
 0x1b3   :  { %v158_v57 = vmul.f32 0.015625, %v154_v56 }
 0x1b5   :  { %v299_v58 = vpop.eup %298  ;;  %v160_v59 = vadd.f32 1e-12, %v158_v57 }
 0x1b6   :  { %v173_v60 = vmul.f32 %v299_v58, %v161_v54  ;;  %vm179_vm1 = vweird.f32 %v299_v58 }
 0x1b7   :  { %300 = vrsqrt.f32 %v160_v59  ;;  %vm180_vm3 = vmor %vm178_vm2, %vm179_vm1  ;;  %vm168_vm5 = vweird.f32 %v160_v59 }
 0x1b8   :  { %v174_v61 = vmul.f32 %v299_v58, %v173_v60 }
 0x1ba   :  { %v175_v62 = vmul.f32 0.5, %v174_v61 }
 0x1bc   :  { %v176_v63 = vsub.f32 1.5, %v175_v62 }
 0x1bd   :  { %v301_v0 = vpop.eup %300 }
 0x1be   :  { %v177_v1 = vmul.f32 %v299_v58, %v176_v63  ;;  %v163_v2 = vmul.f32 %v301_v0, %v160_v59  ;;  %vm169_vm4 = vweird.f32 %v301_v0 }
 0x1bf   :  { %vm170_vm6 = vmor %vm168_vm5, %vm169_vm4 }
 0x1c0   :  { %v181_v4 = vsel %vm180_vm3, %v299_v58, %v177_v1  ;;  %v164_v5 = vmul.f32 %v301_v0, %v163_v2 }
 0x1c1   :  { %v183_v7 = vmul.f32 %v181_v4, %v149_v37 }
 0x1c2   :  { %v165_v8 = vmul.f32 0.5, %v164_v5 }
 0x1c3   :  { %v189_v9 = vmul.f32 %v291_v3, %v183_v7 }
 0x1c4   :  { %v166_v10 = vsub.f32 1.5, %v165_v8 }
 0x1c5   :  { %v195_v11 = vadd.f32 %v292_v6, %v189_v9 }
 0x1c6   :  { %v167_v12 = vmul.f32 %v301_v0, %v166_v10 }
 0x1c7   :  { %197 = vst.msk [vmem:[#allocation2 + $0x8] sm:$0xff] %vm92_vm0, %v195_v11 }
 0x1c8   :  { %v171_v13 = vsel %vm170_vm6, %v301_v0, %v167_v12 }
 0x1c9   :  { %v182_v14 = vmul.f32 %v171_v13, %v476_v42 }
 0x1cb   :  { %v188_v15 = vmul.f32 %v291_v3, %v182_v14 }
 0x1cd   :  { %v194_v16 = vadd.f32 %v292_v6, %v188_v15 }
 0x1ce   :  { %v199_v17 = vld [vmem:[#allocation2 + $0x8] sm:$0xff] }
 0x1cf   :  { %196 = vst.msk [vmem:[#allocation2] sm:$0xff] %vm92_vm0, %v194_v16  ;;  %267 = vmatmul.msk.f32.vlgmr.msra.gmra.mxu3 %vm92_vm0, %v199_v17 }
 0x1d6   :  { %v198_v18 = vld [vmem:[#allocation2] sm:$0xff] }
 0x1d7   :  { %266 = vmatmul.msk.f32.vlgmr.msra.gmra.mxu1 %vm92_vm0, %v198_v18 }
 0x252   :  { %v239_v20 = vpop.f32.mrf.mxu3 }
 0x253   :  { %v240_v21 = vadd.f32 %v293_v19, %v239_v20 }
 0x254   :  { %v236_v22 = vpop.f32.mrf.mxu1 }
 0x255   :  { %243 = vst [vmem:[#allocation9 + $0x8] sm:$0xff] %v240_v21  ;;  %v237_v23 = vadd.f32 %v293_v19, %v236_v22 }
 0x257   :  { %242 = vst [vmem:[#allocation9] sm:$0xff] %v237_v23 }
 0x258   :  { %256 = dma.vmem_to_hbm [thread:$0]  %s249_s21, 256, %s251_s24, [#allocation5], %s405_s9, %s405_s9, %s406_s10  }
 0x259   :  { %402 = dma.done.wait [#allocation5], 256  }
 0x25a   :  { %403 = vsyncadd [#allocation5], 4294967040 }
 0x25b   :  { %261 = vsyncpa [#allocation4], 1 }
 0x25c   :  { %262 = vsyncpa [#allocation7], 1 }
 0x25d   :  { %263 = vsyncpa [#allocation5], 1 }

</bundles_post_ra>
